<compile_context>
chip_gen: v7x
topology: tpu7x:2x2x1
jax: 0.10.0
libtpu: 0.0.40
codegen_flags: <defaults>
</compile_context>

<pallas_src>
import functools

import jax
import jax.numpy as jnp
from jax.experimental import pallas as pl
from jax.experimental.pallas import tpu as pltpu


def _round_up(x, m):
    return (x + m - 1) // m * m


def _vmem_budget():
    """(target bytes per output block, vmem_limit_bytes) per TPU generation."""
    try:
        kind = jax.devices()[0].device_kind.lower()
    except Exception:
        kind = ""
    if "v5" in kind or "v6" in kind:
        return 8 * 1024 * 1024, 64 * 1024 * 1024     # 128 MiB VMEM parts
    return 4 * 1024 * 1024, 32 * 1024 * 1024         # v7x (64 MiB VMEM) / unknown


def _composed_taps(weights):
    """Compose the 4 conv layers' linear parts into one 9-tap kernel g,
    with out[c] = sum_j g[j] * x[c - j]  (x zero-extended)."""
    g = jnp.asarray([1.0], jnp.float32)
    for k in range(4):
        # Layer op: y[c] = w0*s[c-2] + w1*s[c-1] + w2*s[c]  ->  taps reversed.
        g = jnp.convolve(g, weights[k, ::-1].astype(jnp.float32))
    return g  # (9,)


def _bias_field(weights, biases, seq_len):
    """The 4-layer pipeline applied to a zero signal of length seq_len:
    the exact position-dependent bias of the affine composition."""
    s = jnp.zeros((1, seq_len), jnp.float32)
    for k in range(4):
        sp = jnp.pad(s, ((0, 0), (2, 2)))
        m = s.shape[1] + 2
        s = (weights[k, 0] * sp[:, 0:m]
             + weights[k, 1] * sp[:, 1:m + 1]
             + weights[k, 2] * sp[:, 2:m + 2]) + biases[k]
    return s.astype(jnp.float32)  # (1, seq_len + 8)


def conv9_kernel(g_ref, b_ref, x_ref, o_ref, *, width, out_len):
    # g_ref: SMEM (9,)  f32 -- composed 9-tap weights
    # b_ref: VMEM (1, out_len) f32 -- precomputed bias field (broadcast on rows)
    # x_ref: VMEM (block_n, L) tile of the input
    # o_ref: VMEM (block_n, out_len) f32 tile of the output
    block_n = x_ref.shape[0]
    seq_len = x_ref.shape[1]
    x_tile = x_ref[...].astype(jnp.float32)                       # (block_n, L)
    tail = jnp.zeros((block_n, width - seq_len), jnp.float32)     # zero padding
    cur = jnp.concatenate([x_tile, tail], axis=1)                 # (block_n, W)

    # out[c] = sum_{j=0..8} g[j] * cur[c-j]; pltpu.roll(cur, j)[c] = cur[(c-j) % W]
    # and the wrapped lanes always read the zero tail (W >= L + 8).
    acc = g_ref[0] * cur
    for j in range(1, 9):  # static unroll; rolls go to the XLU slot
        acc = acc + g_ref[j] * pltpu.roll(cur, shift=j, axis=1)

    o_ref[...] = (acc[:, :out_len] + b_ref[...]).astype(o_ref.dtype)


def dummy_model_forward(x, weights, biases):
    """x: (N, 1, L); weights: (4, 3); biases: (4,). Returns (N, 1, L + 8) f32."""
    n, ch, seq_len = x.shape
    assert ch == 1, "DummyModel uses single-channel Conv1d layers"
    out_len = seq_len + 8
    width = _round_up(out_len, 128)        # lane-dense internal compute width

    block_bytes, vmem_limit = _vmem_budget()

    # Batch-tile sizing: aim for ~block_bytes of output per block.
    block_n = max(8, (block_bytes // (width * 4)) // 8 * 8)
    if n >= 16:
        # Keep >= 2 grid steps so v7x's two TensorCores both get work.
        block_n = min(block_n, _round_up(pl.cdiv(n, 2), 8))
    if block_n >= n:
        block_n = n                        # single block, exact fit (full-dim block)
    else:
        block_n = max(8, (block_n // 8) * 8)
    grid_n = pl.cdiv(n, block_n)           # ragged last block handled by Pallas

    x2 = x[:, 0, :]                        # (N, L): channel squeeze is a reshape
    g_taps = _composed_taps(weights)       # (9,)
    bias_row = _bias_field(weights, biases, seq_len)   # (1, out_len)

    out = pl.pallas_call(
        functools.partial(conv9_kernel, width=width, out_len=out_len),
        out_shape=jax.ShapeDtypeStruct((n, out_len), jnp.float32),
        grid=(grid_n,),
        in_specs=[
            pl.BlockSpec(memory_space=pltpu.MemorySpace.SMEM),      # g (9,)
            pl.BlockSpec((1, out_len), lambda i: (0, 0)),           # bias row
            pl.BlockSpec((block_n, seq_len), lambda i: (i, 0)),     # x tile
        ],
        out_specs=pl.BlockSpec((block_n, out_len), lambda i: (i, 0)),
        compiler_params=pltpu.CompilerParams(
            dimension_semantics=("parallel",),   # v7x: split batch over 2 TCs
            vmem_limit_bytes=vmem_limit,
        ),
    )(g_taps, bias_row, x2)

    return out[:, None, :]                 # (N, 1, L + 8) -- pure reshape, no copy


# ----------------------------- pure-JAX reference -----------------------------
def reference_forward(x, weights, biases):
    # Straight layer-by-layer Conv1d(1, 1, k=3, stride=1, padding=2), PyTorch
    # semantics: out[c] = sum_j w[j] * xpad[c + j] + b.
    s = x[:, 0, :].astype(jnp.float32)
    for k in range(4):
        sp = jnp.pad(s, ((0, 0), (2, 2)))
        m = s.shape[1] + 2
        s = (weights[k, 0] * sp[:, 0:m]
             + weights[k, 1] * sp[:, 1:m + 1]
             + weights[k, 2] * sp[:, 2:m + 2]) + biases[k]
    return s[:, None, :]


if __name__ == "__main__":
    key = jax.random.PRNGKey(0)
    k_x, k_w, k_b = jax.random.split(key, 3)

    N, L = 2, 16
    x = jax.random.normal(k_x, (N, 1, L), dtype=jnp.float32)

    # PyTorch Conv1d init bound for in_channels=1, kernel_size=3.
    bound = 1.0 / jnp.sqrt(3.0)
    weights = jax.random.uniform(k_w, (4, 3), minval=-bound, maxval=bound,
                                 dtype=jnp.float32)
    biases = jax.random.uniform(k_b, (4,), minval=-bound, maxval=bound,
                                dtype=jnp.float32)

    fwd = jax.jit(dummy_model_forward)
    y = fwd(x, weights, biases)
    y = jax.block_until_ready(y)

    y_ref = reference_forward(x, weights, biases)
    assert y.shape == (N, 1, L + 8), y.shape
    assert jnp.allclose(y, y_ref, atol=1e-5, rtol=1e-5), "mismatch vs reference"

    print("KERNEL_OK")
</pallas_src>

<mosaic_0001>
module attributes {stable_mosaic.version = 11 : i64} {
  func.func @conv9_kernel(%arg0: i32, %arg1: memref<9xf32, #tpu.memory_space<smem>>, %arg2: memref<1x24xf32, #tpu.memory_space<vmem>>, %arg3: memref<2x16xf32, #tpu.memory_space<vmem>>, %arg4: memref<2x24xf32, #tpu.memory_space<vmem>>) attributes {dimension_semantics = [#tpu.dimension_semantics<parallel>], iteration_bounds = array<i64: 1>, scalar_prefetch = 0 : i64, scratch_operands = 0 : i64, tpu.core_type = #tpu.core_type<tc>, window_params = [{transform_indices = @transform_0, window_bounds = array<i64: 9>}, {pipeline_mode = #tpu.pipeline_mode<synchronous>, transform_indices = @transform_1, window_bounds = array<i64: 1, 24>}, {transform_indices = @transform_2, window_bounds = array<i64: 2, 16>}, {transform_indices = @transform_3, window_bounds = array<i64: 2, 24>}]} {
    %c0 = arith.constant 0 : index
    %c0_0 = arith.constant 0 : index
    %0 = vector.load %arg3[%c0, %c0_0] : memref<2x16xf32, #tpu.memory_space<vmem>>, vector<2x16xf32>
    %cst = arith.constant 0.000000e+00 : f32
    %1 = vector.broadcast %cst : f32 to vector<2x112xf32>
    %2 = tpu.concatenate %0, %1 in 1 : vector<2x16xf32>, vector<2x112xf32> -> vector<2x128xf32>
    %c0_1 = arith.constant 0 : index
    %3 = memref.load %arg1[%c0_1] : memref<9xf32, #tpu.memory_space<smem>>
    %4 = vector.broadcast %3 : f32 to vector<2x128xf32>
    %5 = arith.mulf %4, %2 : vector<2x128xf32>
    %c1 = arith.constant 1 : index
    %6 = memref.load %arg1[%c1] : memref<9xf32, #tpu.memory_space<smem>>
    %c1_i32 = arith.constant 1 : i32
    %7 = tpu.dynamic_rotate %2 by %c1_i32 dim 1 : vector<2x128xf32>, i32 -> vector<2x128xf32>
    %8 = vector.broadcast %6 : f32 to vector<2x128xf32>
    %9 = arith.mulf %8, %7 : vector<2x128xf32>
    %10 = arith.addf %5, %9 : vector<2x128xf32>
    %c2 = arith.constant 2 : index
    %11 = memref.load %arg1[%c2] : memref<9xf32, #tpu.memory_space<smem>>
    %c2_i32 = arith.constant 2 : i32
    %12 = tpu.dynamic_rotate %2 by %c2_i32 dim 1 : vector<2x128xf32>, i32 -> vector<2x128xf32>
    %13 = vector.broadcast %11 : f32 to vector<2x128xf32>
    %14 = arith.mulf %13, %12 : vector<2x128xf32>
    %15 = arith.addf %10, %14 : vector<2x128xf32>
    %c3 = arith.constant 3 : index
    %16 = memref.load %arg1[%c3] : memref<9xf32, #tpu.memory_space<smem>>
    %c3_i32 = arith.constant 3 : i32
    %17 = tpu.dynamic_rotate %2 by %c3_i32 dim 1 : vector<2x128xf32>, i32 -> vector<2x128xf32>
    %18 = vector.broadcast %16 : f32 to vector<2x128xf32>
    %19 = arith.mulf %18, %17 : vector<2x128xf32>
    %20 = arith.addf %15, %19 : vector<2x128xf32>
    %c4 = arith.constant 4 : index
    %21 = memref.load %arg1[%c4] : memref<9xf32, #tpu.memory_space<smem>>
    %c4_i32 = arith.constant 4 : i32
    %22 = tpu.dynamic_rotate %2 by %c4_i32 dim 1 : vector<2x128xf32>, i32 -> vector<2x128xf32>
    %23 = vector.broadcast %21 : f32 to vector<2x128xf32>
    %24 = arith.mulf %23, %22 : vector<2x128xf32>
    %25 = arith.addf %20, %24 : vector<2x128xf32>
    %c5 = arith.constant 5 : index
    %26 = memref.load %arg1[%c5] : memref<9xf32, #tpu.memory_space<smem>>
    %c5_i32 = arith.constant 5 : i32
    %27 = tpu.dynamic_rotate %2 by %c5_i32 dim 1 : vector<2x128xf32>, i32 -> vector<2x128xf32>
    %28 = vector.broadcast %26 : f32 to vector<2x128xf32>
    %29 = arith.mulf %28, %27 : vector<2x128xf32>
    %30 = arith.addf %25, %29 : vector<2x128xf32>
    %c6 = arith.constant 6 : index
    %31 = memref.load %arg1[%c6] : memref<9xf32, #tpu.memory_space<smem>>
    %c6_i32 = arith.constant 6 : i32
    %32 = tpu.dynamic_rotate %2 by %c6_i32 dim 1 : vector<2x128xf32>, i32 -> vector<2x128xf32>
    %33 = vector.broadcast %31 : f32 to vector<2x128xf32>
    %34 = arith.mulf %33, %32 : vector<2x128xf32>
    %35 = arith.addf %30, %34 : vector<2x128xf32>
    %c7 = arith.constant 7 : index
    %36 = memref.load %arg1[%c7] : memref<9xf32, #tpu.memory_space<smem>>
    %c7_i32 = arith.constant 7 : i32
    %37 = tpu.dynamic_rotate %2 by %c7_i32 dim 1 : vector<2x128xf32>, i32 -> vector<2x128xf32>
    %38 = vector.broadcast %36 : f32 to vector<2x128xf32>
    %39 = arith.mulf %38, %37 : vector<2x128xf32>
    %40 = arith.addf %35, %39 : vector<2x128xf32>
    %c8 = arith.constant 8 : index
    %41 = memref.load %arg1[%c8] : memref<9xf32, #tpu.memory_space<smem>>
    %c8_i32 = arith.constant 8 : i32
    %42 = tpu.dynamic_rotate %2 by %c8_i32 dim 1 : vector<2x128xf32>, i32 -> vector<2x128xf32>
    %43 = vector.broadcast %41 : f32 to vector<2x128xf32>
    %44 = arith.mulf %43, %42 : vector<2x128xf32>
    %45 = arith.addf %40, %44 : vector<2x128xf32>
    %46 = vector.extract_strided_slice %45 {offsets = [0, 0], sizes = [2, 24], strides = [1, 1]} : vector<2x128xf32> to vector<2x24xf32>
    %c0_2 = arith.constant 0 : index
    %c0_3 = arith.constant 0 : index
    %47 = vector.load %arg2[%c0_2, %c0_3] : memref<1x24xf32, #tpu.memory_space<vmem>>, vector<1x24xf32>
    %48 = vector.broadcast %47 : vector<1x24xf32> to vector<2x24xf32>
    %49 = arith.addf %46, %48 : vector<2x24xf32>
    %c0_4 = arith.constant 0 : index
    %c0_5 = arith.constant 0 : index
    %50 = vector.load %arg4[%c0_4, %c0_5] : memref<2x24xf32, #tpu.memory_space<vmem>>, vector<2x24xf32>
    tpu.vector_store %arg4[%c0_4, %c0_5], %49 {strides = array<i32>} : memref<2x24xf32, #tpu.memory_space<vmem>>, vector<2x24xf32>,
    return
  }
  func.func @transform_0(%arg0: i32) -> i32 {
    %c0_i32 = arith.constant 0 : i32
    %c0_i32_0 = arith.constant 0 : i32
    return %c0_i32 : i32
  }
  func.func @transform_1(%arg0: i32) -> (i32, i32) {
    %c0_i32 = arith.constant 0 : i32
    %c0_i32_0 = arith.constant 0 : i32
    %c0_i32_1 = arith.constant 0 : i32
    return %c0_i32, %c0_i32_0 : i32, i32
  }
  func.func @transform_2(%arg0: i32) -> (i32, i32) {
    %c0_i32 = arith.constant 0 : i32
    %c0_i32_0 = arith.constant 0 : i32
    return %arg0, %c0_i32 : i32, i32
  }
  func.func @transform_3(%arg0: i32) -> (i32, i32) {
    %c0_i32 = arith.constant 0 : i32
    %c0_i32_0 = arith.constant 0 : i32
    return %arg0, %c0_i32 : i32, i32
  }
}

</mosaic_0001>

<bundles_post_ra>
// kernel: dummy_model_forward.1
= control target key start
LH: loop header
LB: loop body
LE: loop exit
PB: predicated region body
PF: predicated region fallthrough
CT: control target
= control target key end

     0   :  { %8 = vsyncpa [#allocation4], 0  ;;  %s215_s0 = inlined_call_operand.vmem [shape: f32[9], index: 0, kind: input, shape index: {}]   ;;  %s216_s1 = inlined_call_operand.vmem [shape: f32[1,24], index: 1, kind: input, shape index: {}]   ;;  %s217_s2 = inlined_call_operand.vmem [shape: f32[2,16], index: 2, kind: input, shape index: {}]   ;;  %s218_s3 = inlined_call_operand.hbm [shape: f32[2,24], index: 3, kind: output, shape index: {}]  }
   0x1   :  { %9 = vsyncpa [#allocation3], 0  ;;  %s16_s14 = sshll.u32 %s215_s0, 4  ;;  %s17_s14 = int_to_ptr.vmem [resolvable:$true] %s16_s14 }
   0x2   :  { %s126_s15 = scalar_lea.vmem %s17_s14, 16  ;;  %p131_p1 = scmp.lt.s32.totalorder %s17_s14, %s17_s14 }
   0x3   :  { %p127_p0 = scmp.ne.s32.totalorder %s17_s14, %s126_s15  ;;  %p132_p2 = scmp.lt.s32.totalorder %s126_s15, %s126_s15 }
   0x5   :  { %p133_p3 = por %p132_p2, %p131_p1 }
   0x7   :  { %p134_p4 = pnand %p133_p3, %p127_p0 }
   0x9   :  { %137 = shalt.err (!%p134_p4)
}
   0xa   :  { %s164_s16 = smov [#allocation2]  }
   0xb   :  { %19 = dma.vmem_to_smem %s17_s14, 16, %s164_s16, [#allocation4]  }
   0xc   :  { %160 = dma.done.wait [#allocation4], 16  }
   0xd   :  { %161 = vsyncadd [#allocation4], 4294967280 }
   0xe   :  { %27 = sfence }
   0xf   :  { %v28_v0 = vld [vmem:[%s217_s2] sm:$0x3]  ;;  %vm29_vm0 = vcmask 130048   ;;  %s165_s0 = smov 1   ;;  %s166_s19 = smov 3   ;;  %vm90_vm1 = vcmask 189440  }
  0x10   :  { %v30_v1 = vsel %vm29_vm0, %v28_v0, 0.0  ;;  %s167_s20 = smov 2   ;;  %s168_s21 = smov 4   ;;  %v115_v35 = vld [vmem:[%s216_s1] ss:$0 sm:$0xff] }
  0x11   :  { %35 = vrot.lane.b32.xlu0 %v30_v1, %s165_s0  ;;  %47 = vrot.lane.b32.xlu1 %v30_v1, %s166_s19  ;;  %s169_s22 = smov 5   ;;  %s170_s23 = smov 6  }
  0x12   :  { %s171_s24 = smov 7   ;;  %s172_s25 = smov 8  }
  0x13   :  { %s31_s26 = sld [smem:[#allocation2]]  ;;  %s107_s2 = sld [smem:[#allocation2 + $0x1]] }
  0x14   :  { %s108_s27 = sld [smem:[#allocation2 + $0x2]]  ;;  %s109_s28 = sld [smem:[#allocation2 + $0x3]] }
  0x15   :  { %41 = vrot.lane.b32.xlu0 %v30_v1, %s167_s20  ;;  %53 = vrot.lane.b32.xlu1 %v30_v1, %s168_s21  ;;  %s110_s29 = sld [smem:[#allocation2 + $0x4]]  ;;  %s111_s30 = sld [smem:[#allocation2 + $0x5]] }
  0x16   :  { %s112_s4 = sld [smem:[#allocation2 + $0x6]]  ;;  %s113_s5 = sld [smem:[#allocation2 + $0x7]] }
  0x17   :  { %s114_s6 = sld [smem:[#allocation2 + $0x8]]  ;;  %s173_s9 = smov [#allocation5]  }
  0x18   :  { %s98_s10 = sshll.u32 %s173_s9, 4  ;;  %s99_s10 = int_to_ptr.vmem [resolvable:$true] %s98_s10 }
  0x19   :  { %59 = vrot.lane.b32.xlu0 %v30_v1, %s169_s22  ;;  %65 = vrot.lane.b32.xlu1 %v30_v1, %s170_s23  ;;  %v32_v2 = vstv %s31_s26  ;;  %v37_v3 = vstv %s107_s2  ;;  %s138_s11 = scalar_lea.vmem %s99_s10, 32  ;;  %p143_p6 = scmp.lt.s32.totalorder %s99_s10, %s99_s10 }
  0x1a   :  { %v33_v6 = vmul.f32 %v32_v2, %v30_v1  ;;  %v43_v8 = vstv %s108_s27  ;;  %v49_v9 = vstv %s109_s28  ;;  %p139_p5 = scmp.ne.s32.totalorder %s99_s10, %s138_s11  ;;  %p144_p7 = scmp.lt.s32.totalorder %s138_s11, %s138_s11 }
  0x1b   :  { %v55_v11 = vstv %s110_s29  ;;  %v61_v15 = vstv %s111_s30 }
  0x1c   :  { %v67_v20 = vstv %s112_s4  ;;  %v73_v24 = vstv %s113_s5  ;;  %p145_p8 = por %p144_p7, %p143_p6 }
  0x1d   :  { %71 = vrot.lane.b32.xlu0 %v30_v1, %s171_s24  ;;  %77 = vrot.lane.b32.xlu1 %v30_v1, %s172_s25  ;;  %v79_v28 = vstv %s114_s6 }
  0x1e   :  { %p146_p9 = pnand %p145_p8, %p139_p5 }
  0x83   :  { %v36_v4 = vpop.permute.xlu0 %35  ;;  %v48_v5 = vpop.permute.xlu1 %47 }
  0x84   :  { %v38_v7 = vmul.f32 %v37_v3, %v36_v4  ;;  %v50_v16 = vmul.f32 %v49_v9, %v48_v5 }
  0x86   :  { %v39_v13 = vadd.f32 %v38_v7, %v33_v6 }
  0x87   :  { %v42_v10 = vpop.permute.xlu0 %41  ;;  %v54_v12 = vpop.permute.xlu1 %53 }
  0x88   :  { %v44_v14 = vmul.f32 %v43_v8, %v42_v10  ;;  %v56_v18 = vmul.f32 %v55_v11, %v54_v12 }
  0x8a   :  { %v45_v17 = vadd.f32 %v44_v14, %v39_v13 }
  0x8b   :  { %v60_v19 = vpop.permute.xlu0 %59  ;;  %v66_v21 = vpop.permute.xlu1 %65 }
  0x8c   :  { %v51_v22 = vadd.f32 %v50_v16, %v45_v17  ;;  %v62_v23 = vmul.f32 %v61_v15, %v60_v19  ;;  %v68_v26 = vmul.f32 %v67_v20, %v66_v21 }
  0x8e   :  { %v57_v25 = vadd.f32 %v56_v18, %v51_v22 }
  0x8f   :  { %v72_v27 = vpop.permute.xlu0 %71  ;;  %v78_v29 = vpop.permute.xlu1 %77 }
  0x90   :  { %v63_v30 = vadd.f32 %v62_v23, %v57_v25  ;;  %v74_v31 = vmul.f32 %v73_v24, %v72_v27  ;;  %v80_v33 = vmul.f32 %v79_v28, %v78_v29 }
  0x92   :  { %v69_v32 = vadd.f32 %v68_v26, %v63_v30 }
  0x94   :  { %v75_v34 = vadd.f32 %v74_v31, %v69_v32 }
  0x96   :  { %v81_v36 = vadd.f32 %v80_v33, %v75_v34 }
  0x98   :  { %v89_v37 = vadd.f32 %v115_v35, %v81_v36 }
  0x9a   :  { %91 = vst.msk [vmem:[#allocation5] sm:$0x3] %vm90_vm1, %v89_v37 }
  0x9b   :  { %149 = shalt.err (!%p146_p9)
}
  0x9c   :  { %s150_s14 = scalar_lea.hbm %s218_s3, 32 }
  0x9d   :  { %p151_p10 = scmp.ne.s32.totalorder %s218_s3, %s150_s14  ;;  %p154_p11 = scmp.lt.u32.totalorder %s150_s14, %s218_s3 }
  0x9f   :  { %p156_p12 = pnand %p154_p11, %p151_p10 }
  0xa1   :  { %159 = shalt.err (!%p156_p12)
}
  0xa2   :  { %101 = dma.vmem_to_hbm [thread:$0]  %s99_s10, 32, %s218_s3, [#allocation3]  }
  0xa3   :  { %162 = dma.done.wait [#allocation3], 32  }
  0xa4   :  { %163 = vsyncadd [#allocation3], 4294967264 }
  0xa5   :  { %105 = vsyncpa [#allocation3], 1 }
  0xa6   :  { %106 = vsyncpa [#allocation4], 1 }

</bundles_post_ra>
